<compile_context>
chip_gen: v6e
topology: v6e:2x2x1
jax: 0.10.0
libtpu: 0.0.40
codegen_flags: <defaults>
</compile_context>

<pallas_src>
import jax
import jax.numpy as jnp
from jax import lax
from jax.experimental import pallas as pl
from jax.experimental.pallas import tpu as pltpu
import numpy as np

LOG2 = float(np.log(2.0))


def _ssp(v):
    # ShiftedSoftplus: softplus(v) - log(2)
    return jax.nn.softplus(v) - LOG2


def attention_interaction_kernel(
    x_ref,       # (N, H)    f32   node features
    ea_ref,      # (E, C)    f32   edge features
    idx_ref,     # (2, E)    int32 [row; col], lane-dense
    wsq_ref,     # (H, 4H)   bf16  [wv | wc | wwv | wo]
    wedge_ref,   # (C+H, H)  bf16  [w1; w2]
    b_ref,       # (5, H)    f32   [b1, b2, bwv, bc, bo]
    out_ref,     # (N, H)    f32
):
    x = x_ref[...]                       # (N, H)
    ea = ea_ref[...]                     # (E, C)
    idx = idx_ref[...]                   # (2, E)
    N, H = x.shape
    E, C = ea.shape

    b = b_ref[...]                       # (5, H)
    b1, b2, bwv, bc, bo = b[0:1], b[1:2], b[2:3], b[3:4], b[4:5]

    wsq = wsq_ref[...]                   # (H, 4H) bf16
    w1 = wedge_ref[0:C, :]               # (C, H)  bf16 (tile-aligned slice)
    w2 = wedge_ref[C:, :]                # (H, H)  bf16

    x_bf = x.astype(jnp.bfloat16)

    # Fused x @ [wv | wc] -> (N, 2H) with f32 MXU accumulation.
    # NOTE: the lane-offset-H split below is not (·,128)-aligned at H=32; it is
    # a tiny lane-select and still cheaper than a second MXU pass (see review).
    xc = jnp.dot(x_bf, wsq[:, : 2 * H], preferred_element_type=jnp.float32)
    h_values = xc[:, :H]                              # v_lin(x)       (N, H)
    centroid = xc[:, H:] + bc                         # centroid_lin(x)(N, H)

    # W_v = weight_v_net(edge_attr) = Lin2(ssp(Lin1(edge_attr)))
    t = jnp.dot(ea.astype(jnp.bfloat16), w1,
                preferred_element_type=jnp.float32) + b1
    t = _ssp(t)
    w_v = jnp.dot(t.astype(jnp.bfloat16), w2,
                  preferred_element_type=jnp.float32) + b2          # (E, H)

    # One shared node-index iota; both one-hots are (N, E) and built directly
    # from the lane-dense (1, E) index rows -> zero relayouts.
    node_iota = lax.broadcasted_iota(jnp.int32, (N, E), 0)
    row_oh = (node_iota == idx[0:1, :]).astype(jnp.bfloat16)        # S[n,e]
    col_oh = (node_iota == idx[1:2, :]).astype(jnp.bfloat16)        # G^T[n,e]

    # Gather h_values[col]: contract dim 0 of both (lhs-transposed MXU dot).
    # TODO(synk): replace with scalar-prefetch / DMA gather at production size.
    h_col = lax.dot_general(col_oh, h_values.astype(jnp.bfloat16),
                            (((0,), (0,)), ((), ())),
                            preferred_element_type=jnp.float32)     # (E, H)

    # msg_j = weight_v_lin(W_v * h_values[col])
    msg = jnp.dot((w_v * h_col).astype(jnp.bfloat16), wsq[:, 2 * H: 3 * H],
                  preferred_element_type=jnp.float32) + bwv         # (E, H)

    # aggr_msg = scatter_sum(msg, row): plain (N,E) @ (E,H) MXU matmul.
    aggr = jnp.dot(row_oh, msg.astype(jnp.bfloat16),
                   preferred_element_type=jnp.float32)              # (N, H)

    # out = out_transform(ssp(centroid_lin(x) + aggr_msg))
    out = _ssp(centroid + aggr)
    out = jnp.dot(out.astype(jnp.bfloat16), wsq[:, 3 * H:],
                  preferred_element_type=jnp.float32) + bo
    out_ref[...] = out.astype(out_ref.dtype)


def pack_params(params):
    """One-time parameter packing (do NOT call per forward)."""
    bf = jnp.bfloat16
    wsq = jnp.concatenate(
        [params["wv"], params["wc"], params["wwv"], params["wo"]],
        axis=1).astype(bf)                                           # (H, 4H)
    wedge = jnp.concatenate([params["w1"], params["w2"]], axis=0).astype(bf)  # (C+H, H)
    bstk = jnp.concatenate(
        [params["b1"], params["b2"], params["bwv"], params["bc"], params["bo"]],
        axis=0).astype(jnp.float32)                                  # (5, H)
    return {"wsq": wsq, "wedge": wedge, "bstk": bstk}


@jax.jit
def attention_interaction_block(x, edge_index, edge_attr, packed):
    N, H = x.shape
    idx = edge_index.astype(jnp.int32)        # (2, E), lane-dense
    vmem = pl.BlockSpec(memory_space=pltpu.MemorySpace.VMEM)
    inputs = (x, edge_attr, idx, packed["wsq"], packed["wedge"], packed["bstk"])
    return pl.pallas_call(
        attention_interaction_kernel,
        out_shape=jax.ShapeDtypeStruct((N, H), jnp.float32),
        in_specs=[vmem] * len(inputs),
        out_specs=vmem,
    )(*inputs)


def reference(x, edge_index, edge_attr, params):
    row, col = edge_index
    h = x @ params["wv"]
    wv = jax.nn.softplus(edge_attr @ params["w1"] + params["b1"]) - LOG2
    wv = wv @ params["w2"] + params["b2"]
    msg = (wv * h[col]) @ params["wwv"] + params["bwv"]
    aggr = jnp.zeros_like(x).at[row].add(msg)
    out = x @ params["wc"] + params["bc"] + aggr
    out = jax.nn.softplus(out) - LOG2
    return out @ params["wo"] + params["bo"]


if __name__ == "__main__":
    N, H, C, E = 16, 32, 16, 64  # nodes, hidden_channels, edge_channels, edges

    key = jax.random.PRNGKey(0)
    keys = jax.random.split(key, 12)
    scale = 0.1
    params = {
        "wv":  scale * jax.random.normal(keys[0], (H, H), jnp.float32),
        "w1":  scale * jax.random.normal(keys[1], (C, H), jnp.float32),
        "b1":  scale * jax.random.normal(keys[2], (1, H), jnp.float32),
        "w2":  scale * jax.random.normal(keys[3], (H, H), jnp.float32),
        "b2":  scale * jax.random.normal(keys[4], (1, H), jnp.float32),
        "wwv": scale * jax.random.normal(keys[5], (H, H), jnp.float32),
        "bwv": scale * jax.random.normal(keys[6], (1, H), jnp.float32),
        "wc":  scale * jax.random.normal(keys[7], (H, H), jnp.float32),
        "bc":  scale * jax.random.normal(keys[8], (1, H), jnp.float32),
        "wo":  scale * jax.random.normal(keys[9], (H, H), jnp.float32),
        "bo":  scale * jax.random.normal(keys[10], (1, H), jnp.float32),
    }

    kx, kr, kc, ke = jax.random.split(keys[11], 4)
    x = jax.random.normal(kx, (N, H), jnp.float32)
    edge_index = jnp.stack([
        jax.random.randint(kr, (E,), 0, N),
        jax.random.randint(kc, (E,), 0, N),
    ], axis=0).astype(jnp.int32)          # (2, E)
    edge_attr = jax.random.normal(ke, (E, C), jnp.float32)

    packed = jax.tree.map(jax.block_until_ready, pack_params(params))  # one-time

    out = attention_interaction_block(x, edge_index, edge_attr, packed)
    out = jax.block_until_ready(out)

    ref = reference(x, edge_index, edge_attr, params)
    # bf16 MXU operands (f32 accumulation) -> slightly looser tolerance vs f32 ref.
    assert np.allclose(np.asarray(out), np.asarray(ref), atol=3e-2, rtol=3e-2)

    print("KERNEL_OK")
</pallas_src>

<mosaic_0001>
module attributes {stable_mosaic.version = 11 : i64} {
  func.func @attention_interaction_kernel(%arg0: memref<16x32xf32, #tpu.memory_space<vmem>>, %arg1: memref<64x16xf32, #tpu.memory_space<vmem>>, %arg2: memref<2x64xi32, #tpu.memory_space<vmem>>, %arg3: memref<32x128xbf16, #tpu.memory_space<vmem>>, %arg4: memref<48x32xbf16, #tpu.memory_space<vmem>>, %arg5: memref<5x32xf32, #tpu.memory_space<vmem>>, %arg6: memref<16x32xf32, #tpu.memory_space<vmem>>) attributes {dimension_semantics = [], scalar_prefetch = 0 : i64, scratch_operands = 0 : i64, tpu.core_type = #tpu.core_type<tc>} {
    %c0 = arith.constant 0 : index
    %c0_0 = arith.constant 0 : index
    %0 = vector.load %arg0[%c0, %c0_0] : memref<16x32xf32, #tpu.memory_space<vmem>>, vector<16x32xf32>
    %c0_1 = arith.constant 0 : index
    %c0_2 = arith.constant 0 : index
    %1 = vector.load %arg1[%c0_1, %c0_2] : memref<64x16xf32, #tpu.memory_space<vmem>>, vector<64x16xf32>
    %c0_3 = arith.constant 0 : index
    %c0_4 = arith.constant 0 : index
    %2 = vector.load %arg2[%c0_3, %c0_4] : memref<2x64xi32, #tpu.memory_space<vmem>>, vector<2x64xi32>
    %c0_5 = arith.constant 0 : index
    %c0_6 = arith.constant 0 : index
    %3 = vector.load %arg5[%c0_5, %c0_6] : memref<5x32xf32, #tpu.memory_space<vmem>>, vector<5x32xf32>
    %4 = vector.extract_strided_slice %3 {offsets = [0, 0], sizes = [1, 32], strides = [1, 1]} : vector<5x32xf32> to vector<1x32xf32>
    %5 = vector.extract_strided_slice %3 {offsets = [1, 0], sizes = [1, 32], strides = [1, 1]} : vector<5x32xf32> to vector<1x32xf32>
    %6 = vector.extract_strided_slice %3 {offsets = [2, 0], sizes = [1, 32], strides = [1, 1]} : vector<5x32xf32> to vector<1x32xf32>
    %7 = vector.extract_strided_slice %3 {offsets = [3, 0], sizes = [1, 32], strides = [1, 1]} : vector<5x32xf32> to vector<1x32xf32>
    %8 = vector.extract_strided_slice %3 {offsets = [4, 0], sizes = [1, 32], strides = [1, 1]} : vector<5x32xf32> to vector<1x32xf32>
    %c0_7 = arith.constant 0 : index
    %c0_8 = arith.constant 0 : index
    %9 = vector.load %arg3[%c0_7, %c0_8] : memref<32x128xbf16, #tpu.memory_space<vmem>>, vector<32x128xbf16>
    %c0_9 = arith.constant 0 : index
    %c0_10 = arith.constant 0 : index
    %10 = vector.load %arg4[%c0_9, %c0_10] : memref<48x32xbf16, #tpu.memory_space<vmem>>, vector<16x32xbf16>
    %c16 = arith.constant 16 : index
    %c0_11 = arith.constant 0 : index
    %11 = vector.load %arg4[%c16, %c0_11] : memref<48x32xbf16, #tpu.memory_space<vmem>>, vector<32x32xbf16>
    %12 = arith.truncf %0 : vector<16x32xf32> to vector<16x32xbf16>
    %13 = vector.extract_strided_slice %9 {offsets = [0, 0], sizes = [32, 64], strides = [1, 1]} : vector<32x128xbf16> to vector<32x64xbf16>
    %cst = arith.constant dense<0.000000e+00> : vector<16x64xf32>
    %14 = tpu.matmul %12, %13, %cst {dimension_numbers = #tpu.dot_dimension_numbers<[1], [0], [0], [1], [0, 0, 1, 1], [], []>} : vector<16x32xbf16>, vector<32x64xbf16>, vector<16x64xf32> -> vector<16x64xf32>
    %15 = vector.extract_strided_slice %14 {offsets = [0, 0], sizes = [16, 32], strides = [1, 1]} : vector<16x64xf32> to vector<16x32xf32>
    %16 = vector.extract_strided_slice %14 {offsets = [0, 32], sizes = [16, 32], strides = [1, 1]} : vector<16x64xf32> to vector<16x32xf32>
    %17 = vector.broadcast %7 : vector<1x32xf32> to vector<16x32xf32>
    %18 = arith.addf %16, %17 : vector<16x32xf32>
    %19 = arith.truncf %1 : vector<64x16xf32> to vector<64x16xbf16>
    %cst_12 = arith.constant dense<0.000000e+00> : vector<64x32xf32>
    %20 = tpu.matmul %19, %10, %cst_12 {dimension_numbers = #tpu.dot_dimension_numbers<[1], [0], [0], [1], [0, 0, 1, 1], [], []>} : vector<64x16xbf16>, vector<16x32xbf16>, vector<64x32xf32> -> vector<64x32xf32>
    %21 = vector.broadcast %4 : vector<1x32xf32> to vector<64x32xf32>
    %22 = arith.addf %20, %21 : vector<64x32xf32>
    %cst_13 = arith.constant 0.000000e+00 : f32
    %23 = vector.broadcast %cst_13 : f32 to vector<64x32xf32>
    %24 = arith.maximumf %22, %23 : vector<64x32xf32>
    %25 = vector.broadcast %cst_13 : f32 to vector<64x32xf32>
    %26 = arith.subf %22, %25 : vector<64x32xf32>
    %27 = arith.cmpf one, %26, %26 : vector<64x32xf32>
    %28 = vector.broadcast %cst_13 : f32 to vector<64x32xf32>
    %29 = arith.addf %22, %28 : vector<64x32xf32>
    %30 = math.absf %26 : vector<64x32xf32>
    %cst_14 = arith.constant 0.000000e+00 : f32
    %31 = vector.broadcast %cst_14 : f32 to vector<64x32xf32>
    %32 = arith.subf %31, %30 : vector<64x32xf32>
    %33 = math.exp %32 : vector<64x32xf32>
    %34 = math.log1p %33 : vector<64x32xf32>
    %35 = arith.addf %24, %34 : vector<64x32xf32>
    %36 = arith.select %27, %29, %35 : vector<64x32xi1>, vector<64x32xf32>
    %cst_15 = arith.constant 0.693147182 : f32
    %37 = vector.broadcast %cst_15 : f32 to vector<64x32xf32>
    %38 = arith.subf %36, %37 : vector<64x32xf32>
    %39 = arith.truncf %38 : vector<64x32xf32> to vector<64x32xbf16>
    %cst_16 = arith.constant dense<0.000000e+00> : vector<64x32xf32>
    %40 = tpu.matmul %39, %11, %cst_16 {dimension_numbers = #tpu.dot_dimension_numbers<[1], [0], [0], [1], [0, 0, 1, 1], [], []>} : vector<64x32xbf16>, vector<32x32xbf16>, vector<64x32xf32> -> vector<64x32xf32>
    %41 = vector.broadcast %5 : vector<1x32xf32> to vector<64x32xf32>
    %42 = arith.addf %40, %41 : vector<64x32xf32>
    %43 = tpu.iota {dimensions = array<i32: 0>} : vector<16x64xi32>
    %44 = vector.extract_strided_slice %2 {offsets = [0, 0], sizes = [1, 64], strides = [1, 1]} : vector<2x64xi32> to vector<1x64xi32>
    %45 = vector.broadcast %44 : vector<1x64xi32> to vector<16x64xi32>
    %46 = arith.cmpi eq, %43, %45 : vector<16x64xi32>
    %47 = arith.extui %46 : vector<16x64xi1> to vector<16x64xi32>
    %48 = arith.sitofp %47 : vector<16x64xi32> to vector<16x64xf32>
    %49 = arith.truncf %48 : vector<16x64xf32> to vector<16x64xbf16>
    %50 = vector.extract_strided_slice %2 {offsets = [1, 0], sizes = [1, 64], strides = [1, 1]} : vector<2x64xi32> to vector<1x64xi32>
    %51 = vector.broadcast %50 : vector<1x64xi32> to vector<16x64xi32>
    %52 = arith.cmpi eq, %43, %51 : vector<16x64xi32>
    %53 = arith.extui %52 : vector<16x64xi1> to vector<16x64xi32>
    %54 = arith.sitofp %53 : vector<16x64xi32> to vector<16x64xf32>
    %55 = arith.truncf %54 : vector<16x64xf32> to vector<16x64xbf16>
    %56 = arith.truncf %15 : vector<16x32xf32> to vector<16x32xbf16>
    %cst_17 = arith.constant dense<0.000000e+00> : vector<64x32xf32>
    %57 = tpu.matmul %55, %56, %cst_17 {dimension_numbers = #tpu.dot_dimension_numbers<[0], [0], [1], [1], [0, 1, 1, 1], [], []>} : vector<16x64xbf16>, vector<16x32xbf16>, vector<64x32xf32> -> vector<64x32xf32>
    %58 = arith.mulf %42, %57 : vector<64x32xf32>
    %59 = arith.truncf %58 : vector<64x32xf32> to vector<64x32xbf16>
    %60 = vector.extract_strided_slice %9 {offsets = [0, 64], sizes = [32, 32], strides = [1, 1]} : vector<32x128xbf16> to vector<32x32xbf16>
    %cst_18 = arith.constant dense<0.000000e+00> : vector<64x32xf32>
    %61 = tpu.matmul %59, %60, %cst_18 {dimension_numbers = #tpu.dot_dimension_numbers<[1], [0], [0], [1], [0, 0, 1, 1], [], []>} : vector<64x32xbf16>, vector<32x32xbf16>, vector<64x32xf32> -> vector<64x32xf32>
    %62 = vector.broadcast %6 : vector<1x32xf32> to vector<64x32xf32>
    %63 = arith.addf %61, %62 : vector<64x32xf32>
    %64 = arith.truncf %63 : vector<64x32xf32> to vector<64x32xbf16>
    %cst_19 = arith.constant dense<0.000000e+00> : vector<16x32xf32>
    %65 = tpu.matmul %49, %64, %cst_19 {dimension_numbers = #tpu.dot_dimension_numbers<[1], [0], [0], [1], [0, 0, 1, 1], [], []>} : vector<16x64xbf16>, vector<64x32xbf16>, vector<16x32xf32> -> vector<16x32xf32>
    %66 = arith.addf %18, %65 : vector<16x32xf32>
    %cst_20 = arith.constant 0.000000e+00 : f32
    %67 = vector.broadcast %cst_20 : f32 to vector<16x32xf32>
    %68 = arith.maximumf %66, %67 : vector<16x32xf32>
    %69 = vector.broadcast %cst_20 : f32 to vector<16x32xf32>
    %70 = arith.subf %66, %69 : vector<16x32xf32>
    %71 = arith.cmpf one, %70, %70 : vector<16x32xf32>
    %72 = vector.broadcast %cst_20 : f32 to vector<16x32xf32>
    %73 = arith.addf %66, %72 : vector<16x32xf32>
    %74 = math.absf %70 : vector<16x32xf32>
    %cst_21 = arith.constant 0.000000e+00 : f32
    %75 = vector.broadcast %cst_21 : f32 to vector<16x32xf32>
    %76 = arith.subf %75, %74 : vector<16x32xf32>
    %77 = math.exp %76 : vector<16x32xf32>
    %78 = math.log1p %77 : vector<16x32xf32>
    %79 = arith.addf %68, %78 : vector<16x32xf32>
    %80 = arith.select %71, %73, %79 : vector<16x32xi1>, vector<16x32xf32>
    %cst_22 = arith.constant 0.693147182 : f32
    %81 = vector.broadcast %cst_22 : f32 to vector<16x32xf32>
    %82 = arith.subf %80, %81 : vector<16x32xf32>
    %83 = arith.truncf %82 : vector<16x32xf32> to vector<16x32xbf16>
    %84 = vector.extract_strided_slice %9 {offsets = [0, 96], sizes = [32, 32], strides = [1, 1]} : vector<32x128xbf16> to vector<32x32xbf16>
    %cst_23 = arith.constant dense<0.000000e+00> : vector<16x32xf32>
    %85 = tpu.matmul %83, %84, %cst_23 {dimension_numbers = #tpu.dot_dimension_numbers<[1], [0], [0], [1], [0, 0, 1, 1], [], []>} : vector<16x32xbf16>, vector<32x32xbf16>, vector<16x32xf32> -> vector<16x32xf32>
    %86 = vector.broadcast %8 : vector<1x32xf32> to vector<16x32xf32>
    %87 = arith.addf %85, %86 : vector<16x32xf32>
    %c0_24 = arith.constant 0 : index
    %c0_25 = arith.constant 0 : index
    %88 = vector.load %arg6[%c0_24, %c0_25] : memref<16x32xf32, #tpu.memory_space<vmem>>, vector<16x32xf32>
    tpu.vector_store %arg6[%c0_24, %c0_25], %87 {strides = array<i32>} : memref<16x32xf32, #tpu.memory_space<vmem>>, vector<16x32xf32>,
    return
  }
}

</mosaic_0001>

<bundles_post_ra>
// kernel: attention_interaction_block.1
= control target key start
LH: loop header
LB: loop body
LE: loop exit
PB: predicated region body
PF: predicated region fallthrough
CT: control target
= control target key end

     0   :  { %v105_v1 = vlaneseq  ;;  %vm129_vm0 = vcmask 130048   ;;  %v1066_v9 = vmov 0.0   ;;  %vm1067_vm1 = vmmov 0   ;;  %s1068_s25 = smov 64   ;;  %s1391_s0 = inlined_call_operand.vmem [shape: f32[16,32], index: 0, kind: input, shape index: {}]   ;;  %s1392_s1 = inlined_call_operand.vmem [shape: f32[64,16], index: 1, kind: input, shape index: {}]   ;;  %s1393_s2 = inlined_call_operand.vmem [shape: s32[2,64], index: 2, kind: input, shape index: {}]   ;;  %s1394_s3 = inlined_call_operand.vmem [shape: bf16[32,128], index: 3, kind: input, shape index: {}]   ;;  %s1395_s4 = inlined_call_operand.vmem [shape: bf16[48,32], index: 4, kind: input, shape index: {}]   ;;  %s1396_s5 = inlined_call_operand.vmem [shape: f32[5,32], index: 5, kind: input, shape index: {}]   ;;  %s1397_s6 = inlined_call_operand.hbm [shape: f32[16,32], index: 6, kind: output, shape index: {}]  }
   0x1   :  { %v999_v0 = vld [vmem:[%s1395_s4] sm:$0xff]   ;;  %v28_v3 = vld [vmem:[%s1392_s1 + $0x8] sm:$0xff]  ;;  %v29_v4 = vld [vmem:[%s1392_s1 + $0x10] sm:$0xff]  ;;  %918 = vmatprep.subr.bf16.mxu0 %v1066_v9  ;;  %922 = vmatprep.mubr.msk.bf16.mxu0 %vm1067_vm1, %v1066_v9 }
   0x2   :  { %v27_v2 = vld [vmem:[%s1392_s1] sm:$0xff]  ;;  %926 = vmatprep.subr.bf16.mxu1 %v999_v0  ;;  %v30_v6 = vld [vmem:[%s1392_s1 + $0x18] sm:$0xff]  ;;  %v32_v8 = vld [vmem:[%s1392_s1 + $0x28] sm:$0xff]  ;;  %v1131_v10 = vshrl.u32 %v105_v1, 7 }
   0x3   :  { %v115_v5 = vpack.c.bf16 %v28_v3, %v27_v2  ;;  %v31_v7 = vld [vmem:[%s1392_s1 + $0x20] sm:$0xff]  ;;  %927 = vmatpush3.bf16.msra.mxu1 %v999_v0  ;;  %v116_v11 = vpack.c.bf16 %v30_v6, %v29_v4  ;;  %v33_v13 = vld [vmem:[%s1392_s1 + $0x30] sm:$0xff]  ;;  %v34_v14 = vld [vmem:[%s1392_s1 + $0x38] sm:$0xff] }
   0x4   :  { %v117_v12 = vpack.c.bf16 %v32_v8, %v31_v7  ;;  %v1145_v15 = vld [vmem:[%s1394_s3 + $0x8] sm:$0xff]   ;;  %v107_v16 = vsub.s32 3, %v1131_v10  ;;  %v1151_v17 = vld [vmem:[%s1394_s3] sm:$0xff]   ;;  %v121_v19 = vsub.s32 0, %v1131_v10  ;;  %v365_v23 = vsub.s32 1, %v1131_v10 }
   0x5   :  { %928 = vmatprep.mubr.msk.bf16.mxu1 %vm129_vm0, %v115_v5  ;;  %v25_v18 = vld [vmem:[%s1391_s0] sm:$0xff]  ;;  %919 = vmatpush3.bf16.msra.mxu0 %v1145_v15  ;;  %v26_v20 = vld [vmem:[%s1391_s0 + $0x8] sm:$0xff]  ;;  %v458_v24 = vadd.s32 8, %v1131_v10 }
   0x6   :  { %929 = vmatmul.mubr.msk.bf16.vlgmr.msra.gmra.mxu1 %vm129_vm0, %v116_v11  ;;  %v1165_v21 = vld [vmem:[%s1396_s5] sm:$0x1f]  ;;  %920 = vmatprep.subr.bf16.mxu0 %v1066_v9 }
   0x7   :  { %v35_v22 = vld [vmem:[%s1393_s2] sm:$0x3]  ;;  %932 = vmatprep.mubr.msk.bf16.mxu1 %vm129_vm0, %v117_v12  ;;  %591 = vrot.lane.b32.xlu1 %v1151_v17, %s1068_s25  ;;  %v108_v25 = vrot.slane %v1165_v21, %v107_v16 }
   0x8   :  { %v473_v26 = vrot.slane %v35_v22, %v365_v23  ;;  %v462_v27 = vrot.slane %v35_v22, %v121_v19 }
   0x9   :  { %11 = vsyncpa [#allocation3], 0  ;;  %v118_v28 = vpack.c.bf16 %v34_v14, %v33_v13  ;;  %v47_v29 = vpack.c.bf16 %v26_v20, %v25_v18  ;;  %vm60_vm2 = vcmask 261120   ;;  %921 = vmatpush3.bf16.msra.mxu0 %v1151_v17  ;;  %s1069_s0 = smov 32   ;;  %v1002_v36 = vld [vmem:[%s1395_s4 + $0x10] sm:$0xff]   ;;  %v1003_v38 = vld [vmem:[%s1395_s4 + $0x8] sm:$0xff]   ;;  %v122_v43 = vrot.slane %v1165_v21, %v121_v19 }
   0xa   :  { %vm474_vm3 = vcmp.eq.s32.totalorder %v1131_v10, %v473_v26  ;;  %vm475_vm4 = vcmp.eq.s32.totalorder %v458_v24, %v473_v26  ;;  %vm463_vm5 = vcmp.eq.s32.totalorder %v1131_v10, %v462_v27  ;;  %vm464_vm6 = vcmp.eq.s32.totalorder %v458_v24, %v462_v27  ;;  %936 = vmatprep.subr.bf16.mxu0 %v1002_v36  ;;  %s1070_s4 = smov 96   ;;  %s1071_s28 = smov [#allocation2]  }
   0xb   :  { %v871_v30 = vsel %vm474_vm3, 1.0, %v1066_v9  ;;  %v872_v31 = vsel %vm475_vm4, 1.0, %v1066_v9  ;;  %v1184_v32 = vsel %vm463_vm5, 1.0, %v1066_v9  ;;  %v1187_v33 = vsel %vm464_vm6, 1.0, %v1066_v9  ;;  %110 = vrot.lane.b32.xlu1 %v108_v25, %s1069_s0  ;;  %s836_s29 = sshll.u32 %s1071_s28, 4  ;;  %s837_s29 = int_to_ptr.vmem [resolvable:$true] %s836_s29 }
   0xc   :  { %v480_v34 = vpack.c.bf16 %v872_v31, %v871_v30  ;;  %v469_v35 = vpack.c.bf16 %v1187_v33, %v1184_v32  ;;  %923 = vmatmul.mubr.msk.bf16.vlgmr.msra.gmra.mxu0 %vm60_vm2, %v47_v29  ;;  %s1044_s30 = scalar_lea.vmem %s837_s29, 256  ;;  %p1049_p1 = scmp.lt.s32.totalorder %s837_s29, %s837_s29 }
   0xd   :  { %937 = vmatpush3.bf16.msra.mxu0 %v1002_v36  ;;  %p1045_p0 = scmp.ne.s32.totalorder %s837_s29, %s1044_s30  ;;  %p1050_p2 = scmp.lt.s32.totalorder %s1044_s30, %s1044_s30 }
   0xe   :  { %933 = vmatmul.mubr.msk.bf16.gmra.mxu1 %vm129_vm0, %v118_v28  ;;  %482 = vxpose.xlu0.c.b16.start.end [1/1] (short) (narrow) %v480_v34, 64 }
   0xf   :  { %938 = vmatprep.subr.bf16.mxu0 %v1003_v38  ;;  %p1051_p3 = por %p1050_p2, %p1049_p1 }
  0x11   :  { %939 = vmatpush3.bf16.msra.mxu0 %v1003_v38  ;;  %p1052_p4 = pnand %p1051_p3, %p1045_p0 }
  0x23   :  { %593 = vrot.lane.b32.xlu0 %v1145_v15, %s1068_s25 }
  0x70   :  { %v490_v37 = vpop.trf.xlu0 }
  0x71   :  { %950 = vmatprep.mubr.msk.bf16.mxu1 %vm129_vm0, %v490_v37 }
  0x74   :  { %v491_v39 = vpop.trf.xlu0 }
  0x78   :  { %v492_v40 = vpop.trf.xlu0 }
  0x7c   :  { %v1202_v41 = vpop.trf.xlu0 }
  0x95   :  { %v1204_v42 = vpop.permute.xlu0 %593 }
  0x96   :  { %958 = vmatprep.subr.bf16.mxu0 %v1204_v42 }
  0xc6   :  { %v930_v44 = vpop.f32.mrf.mxu1 }
  0xc7   :  { %v1208_v45 = vadd.f32 %v930_v44, %v122_v43 }
  0xc8   :  { %v176_v46 = vpop.f32.mrf.mxu1 }
  0xc9   :  { %v233_v47 = vand.u32 2147483647, %v1208_v45  ;;  %v1211_v48 = vadd.f32 %v176_v46, %v122_v43  ;;  %vm217_vm9 = vcmp.ne.f32.partialorder %v1208_v45, %v1208_v45 }
  0xca   :  { %v931_v49 = vpop.f32.mrf.mxu1 }
  0xcb   :  { %v241_v50 = vsub.f32 0.0, %v233_v47  ;;  %v231_v51 = vand.u32 2147483647, %v1211_v48  ;;  %v1214_v52 = vadd.f32 %v931_v49, %v122_v43  ;;  %vm215_vm7 = vcmp.ne.f32.partialorder %v1211_v48, %v1211_v48 }
  0xcc   :  { %v179_v53 = vpop.f32.mrf.mxu1  ;;  %v1218_v57 = vpop.f32.mrf.mxu0 }
  0xcd   :  { %v251_v54 = vmul.f32 1.442695, %v241_v50  ;;  %v239_v55 = vsub.f32 0.0, %v231_v51  ;;  %v1216_v56 = vadd.f32 %v179_v53, %v122_v43  ;;  %v234_v58 = vand.u32 2147483647, %v1214_v52 }
  0xce   :  { %v934_v59 = vpop.f32.mrf.mxu1  ;;  %v924_v61 = vpop.f32.mrf.mxu0  ;;  %v209_v53 = vmax.f32 %v1208_v45, 0.0  ;;  %vm218_vm8 = vcmp.ne.f32.partialorder %v1214_v52, %v1214_v52 }
  0xcf   :  { %1004 = vpow2.f32 %v251_v54  ;;  %v247_v60 = vmul.f32 1.442695, %v239_v55  ;;  %v242_v62 = vsub.f32 0.0, %v234_v58  ;;  %v232_v63 = vand.u32 2147483647, %v1216_v56 }
  0xd0   :  { %v1222_v0 = vadd.f32 %v934_v59, %v122_v43  ;;  %v192_v1 = vpop.f32.mrf.mxu1  ;;  %v1226_v3 = vpop.f32.mrf.mxu0  ;;  %v207_v55 = vmax.f32 %v1211_v48, 0.0  ;;  %v210_v58 = vmax.f32 %v1214_v52, 0.0  ;;  %vm216_vm12 = vcmp.ne.f32.partialorder %v1216_v56, %v1216_v56 }
  0xd1   :  { %1006 = vpow2.f32 %v247_v60  ;;  %v1224_v2 = vadd.f32 %v192_v1, %v122_v43  ;;  %v253_v4 = vmul.f32 1.442695, %v242_v62  ;;  %v240_v5 = vsub.f32 0.0, %v232_v63 }
  0xd2   :  { %v935_v6 = vpop.f32.mrf.mxu1  ;;  %v237_v7 = vand.u32 2147483647, %v1222_v0  ;;  %v925_v11 = vpop.f32.mrf.mxu0  ;;  %v481_v16 = vpack.c.bf16 %v1226_v3, %v1218_v57  ;;  %v208_v60 = vmax.f32 %v1216_v56, 0.0  ;;  %v213_v1 = vmax.f32 %v1222_v0, 0.0 }
  0xd3   :  { %v235_v8 = vand.u32 2147483647, %v1224_v2  ;;  %1008 = vpow2.f32 %v253_v4  ;;  %v249_v12 = vmul.f32 1.442695, %v240_v5  ;;  %v1230_v13 = vadd.f32 %v935_v6, %v122_v43 }
  0xd4   :  { %v195_v14 = vpop.f32.mrf.mxu1  ;;  %v245_v18 = vsub.f32 0.0, %v237_v7  ;;  %948 = vmatprep.subr.bf16.mxu1 %v481_v16  ;;  %vm219_vm5 = vcmp.ne.f32.partialorder %v1224_v2, %v1224_v2  ;;  %vm221_vm6 = vcmp.ne.f32.partialorder %v1222_v0, %v1222_v0 }
  0xd5   :  { %v243_v19 = vsub.f32 0.0, %v235_v8  ;;  %v1234_v20 = vadd.f32 %v195_v14, %v122_v43  ;;  %1010 = vpow2.f32 %v249_v12  ;;  %v238_v22 = vand.u32 2147483647, %v1230_v13  ;;  %949 = vmatpush3.bf16.msra.mxu1 %v481_v16 }
  0xd6   :  { %v259_v24 = vmul.f32 1.442695, %v245_v18  ;;  %970 = vmatprep.subr.bf16.mxu1 %v1066_v9  ;;  %v211_v8 = vmax.f32 %v1224_v2, 0.0  ;;  %v214_v16 = vmax.f32 %v1230_v13, 0.0 }
  0xd7   :  { %v255_v25 = vmul.f32 1.442695, %v243_v19  ;;  %v246_v26 = vsub.f32 0.0, %v238_v22  ;;  %v236_v27 = vand.u32 2147483647, %v1234_v20 }
  0xd8   :  { %1012 = vpow2.f32 %v259_v24  ;;  %951 = vmatmul.mubr.msk.bf16.vlgmr.msra.gmra.mxu1 %vm129_vm0, %v491_v39 }
  0xd9   :  { %1014 = vpow2.f32 %v255_v25  ;;  %v261_v28 = vmul.f32 1.442695, %v246_v26  ;;  %v244_v29 = vsub.f32 0.0, %v236_v27  ;;  %954 = vmatprep.mubr.msk.bf16.mxu1 %vm129_vm0, %v492_v40 }
  0xdb   :  { %1016 = vpow2.f32 %v261_v28  ;;  %v257_v31 = vmul.f32 1.442695, %v244_v29 }
  0xdc   :  { %v1005_v30 = vpop.eup %1004 }
  0xdd   :  { %v281_v34 = vadd.f32 1.0, %v1005_v30  ;;  %1018 = vpow2.f32 %v257_v31  ;;  %v284_v40 = vmul.f32 -0.5, %v1005_v30  ;;  %v287_v6 = vand.u32 2147483647, %v1005_v30 }
  0xde   :  { %v1007_v36 = vpop.eup %1006 }
  0xdf   :  { %1020 = vlog2.f32 %v281_v34  ;;  %v263_v37 = vadd.f32 1.0, %v1007_v36  ;;  %v266_v49 = vmul.f32 -0.5, %v1007_v36  ;;  %v285_v54 = vadd.f32 1.0, %v284_v40 }
  0xe0   :  { %v1241_v38 = vpop.eup %1008  ;;  %955 = vmatmul.mubr.msk.bf16.gmra.mxu1 %vm129_vm0, %v1202_v41  ;;  %v269_v7 = vand.u32 2147483647, %v1007_v36  ;;  %vm1281_vm10 = vcmp.lt.f32.partialorder %v287_v6, 0.0004427343 }
  0xe1   :  { %1022 = vlog2.f32 %v263_v37  ;;  %v290_v43 = vadd.f32 1.0, %v1241_v38  ;;  %978 = vmatprep.mubr.msk.bf16.mxu1 %vm1067_vm1, %v1066_v9  ;;  %v293_v59 = vmul.f32 -0.5, %v1241_v38  ;;  %v267_v62 = vadd.f32 1.0, %v266_v49 }
  0xe2   :  { %v1246_v44 = vpop.eup %1010  ;;  %v286_v14 = vmul.f32 %v1005_v30, %v285_v54  ;;  %v296_v22 = vand.u32 2147483647, %v1241_v38  ;;  %vm270_vm11 = vcmp.lt.f32.partialorder %v269_v7, 0.0004427343 }
  0xe3   :  { %1024 = vlog2.f32 %v290_v43  ;;  %v272_v39 = vadd.f32 1.0, %v1246_v44  ;;  %v275_v63 = vmul.f32 -0.5, %v1246_v44  ;;  %v294_v19 = vadd.f32 1.0, %v293_v59 }
  0xe4   :  { %v268_v26 = vmul.f32 %v1007_v36, %v267_v62  ;;  %v278_v30 = vand.u32 2147483647, %v1246_v44  ;;  %vm297_vm13 = vcmp.lt.f32.partialorder %v296_v22, 0.0004427343 }
  0xe5   :  { %v1251_v46 = vpop.eup %1012  ;;  %1026 = vlog2.f32 %v272_v39  ;;  %v276_v27 = vadd.f32 1.0, %v275_v63  ;;  %v295_v40 = vmul.f32 %v1241_v38, %v294_v19 }
  0xe6   :  { %v1253_v47 = vpop.eup %1014  ;;  %v317_v50 = vadd.f32 1.0, %v1251_v46  ;;  %v320_v24 = vmul.f32 -0.5, %v1251_v46  ;;  %v323_v36 = vand.u32 2147483647, %v1251_v46  ;;  %vm279_vm14 = vcmp.lt.f32.partialorder %v278_v30, 0.0004427343 }
  0xe7   :  { %v299_v51 = vadd.f32 1.0, %v1253_v47  ;;  %v302_v28 = vmul.f32 -0.5, %v1253_v47  ;;  %v305_v43 = vand.u32 2147483647, %v1253_v47  ;;  %v277_v59 = vmul.f32 %v1246_v44, %v276_v27 }
  0xe8   :  { %v1257_v41 = vpop.eup %1016  ;;  %1028 = vlog2.f32 %v317_v50  ;;  %v321_v49 = vadd.f32 1.0, %v320_v24  ;;  %vm1296_vm15 = vcmp.lt.f32.partialorder %v323_v36, 0.0004427343 }
  0xe9   :  { %1030 = vlog2.f32 %v299_v51  ;;  %v326_v4 = vadd.f32 1.0, %v1257_v41  ;;  %v329_v50 = vmul.f32 -0.5, %v1257_v41  ;;  %v303_v62 = vadd.f32 1.0, %v302_v28 }
  0xea   :  { %v1264_v61 = vpop.eup %1018  ;;  %vm1300_vm0 = vcmp.lt.f32.partialorder %v305_v43, 0.0004427343  ;;  %v322_v44 = vmul.f32 %v1251_v46, %v321_v49 }
  0xeb   :  { %v308_v11 = vadd.f32 1.0, %v1264_v61  ;;  %1032 = vlog2.f32 %v326_v4  ;;  %v311_v6 = vmul.f32 -0.5, %v1264_v61 }
  0xec   :  { %v1021_v5 = vpop.eup %1020 }
  0xed   :  { %v283_v12 = vmul.f32 0.6931472, %v1021_v5  ;;  %1034 = vlog2.f32 %v308_v11  ;;  %v312_v27 = vadd.f32 1.0, %v311_v6 }
  0xee   :  { %v1023_v18 = vpop.eup %1022 }
  0xef   :  { %v265_v25 = vmul.f32 0.6931472, %v1023_v18  ;;  %v289_v34 = vsel %vm1281_vm10, %v286_v14, %v283_v12  ;;  %v330_v14 = vadd.f32 1.0, %v329_v50 }
  0xf0   :  { %v1025_v31 = vpop.eup %1024  ;;  %v337_v63 = vadd.f32 %v289_v34, %v209_v53  ;;  %v332_v53 = vand.u32 2147483647, %v1257_v41 }
  0xf1   :  { %v271_v37 = vsel %vm270_vm11, %v268_v26, %v265_v25  ;;  %v292_v39 = vmul.f32 0.6931472, %v1025_v31  ;;  %v304_v26 = vmul.f32 %v1253_v47, %v303_v62 }
  0xf2   :  { %v1027_v51 = vpop.eup %1026  ;;  %v335_v54 = vadd.f32 %v271_v37, %v207_v55  ;;  %v345_v46 = vsel %vm217_vm9, %v1208_v45, %v337_v63  ;;  %vm333_vm3 = vcmp.lt.f32.partialorder %v332_v53, 0.0004427343  ;;  %vm678_vm9 = vcmask 523264  }
  0xf3   :  { %v298_v4 = vsel %vm297_vm13, %v295_v40, %v292_v39  ;;  %v274_v5 = vmul.f32 0.6931472, %v1027_v51  ;;  %v857_v34 = vadd.f32 -0.6931472, %v345_v46  ;;  %v313_v40 = vmul.f32 %v1264_v61, %v312_v27 }
  0xf4   :  { %v338_v7 = vadd.f32 %v298_v4, %v210_v58  ;;  %v343_v58 = vsel %vm215_vm7, %v1211_v48, %v335_v54  ;;  %v212_v54 = vmax.f32 %v1234_v20, 0.0  ;;  %vm222_vm7 = vcmp.ne.f32.partialorder %v1230_v13, %v1230_v13 }
  0xf5   :  { %v1029_v55 = vpop.eup %1028  ;;  %v280_v12 = vsel %vm279_vm14, %v277_v59, %v274_v5  ;;  %v855_v30 = vadd.f32 -0.6931472, %v343_v58 }
  0xf6   :  { %v1031_v18 = vpop.eup %1030  ;;  %v346_v19 = vsel %vm218_vm8, %v1214_v52, %v338_v7  ;;  %v336_v22 = vadd.f32 %v280_v12, %v208_v60  ;;  %v319_v24 = vmul.f32 0.6931472, %v1029_v55  ;;  %v314_v60 = vand.u32 2147483647, %v1264_v61 }
  0xf7   :  { %v301_v25 = vmul.f32 0.6931472, %v1031_v18  ;;  %v858_v28 = vadd.f32 -0.6931472, %v346_v19  ;;  %vm220_vm8 = vcmp.ne.f32.partialorder %v1234_v20, %v1234_v20 }
  0xf8   :  { %v344_v48 = vsel %vm216_vm12, %v1216_v56, %v336_v22  ;;  %v325_v52 = vsel %vm1296_vm15, %v322_v44, %v319_v24  ;;  %v1033_v29 = vpop.eup %1032  ;;  %v331_v56 = vmul.f32 %v1257_v41, %v330_v14  ;;  %vm315_vm4 = vcmp.lt.f32.partialorder %v314_v60, 0.0004427343 }
  0xf9   :  { %v856_v31 = vadd.f32 -0.6931472, %v344_v48  ;;  %v307_v45 = vsel %vm1300_vm0, %v304_v26, %v301_v25  ;;  %v328_v36 = vmul.f32 0.6931472, %v1033_v29  ;;  %v341_v43 = vadd.f32 %v325_v52, %v213_v1 }
  0xfa   :  { %v1035_v47 = vpop.eup %1034  ;;  %v339_v37 = vadd.f32 %v307_v45, %v211_v8  ;;  %v360_v50 = vpack.c.bf16 %v858_v28, %v857_v34 }
  0xfb   :  { %v310_v39 = vmul.f32 0.6931472, %v1035_v47  ;;  %v359_v49 = vpack.c.bf16 %v856_v31, %v855_v30  ;;  %v334_v51 = vsel %vm333_vm3, %v331_v56, %v328_v36  ;;  %v349_v1 = vsel %vm221_vm6, %v1222_v0, %v341_v43 }
  0xfc   :  { %v342_v8 = vadd.f32 %v334_v51, %v214_v16  ;;  %v347_v41 = vsel %vm219_vm5, %v1224_v2, %v339_v37  ;;  %v592_v16 = vpop.permute.xlu1 %591  ;;  %v861_v6 = vadd.f32 -0.6931472, %v349_v1 }
  0xfd   :  { %v316_v59 = vsel %vm315_vm4, %v313_v40, %v310_v39  ;;  %940 = vmatprep.mubr.msk.bf16.mxu0 %vm60_vm2, %v359_v49  ;;  %v859_v2 = vadd.f32 -0.6931472, %v347_v41 }
  0xfe   :  { %v340_v61 = vadd.f32 %v316_v59, %v212_v54  ;;  %941 = vmatmul.mubr.msk.bf16.vlgmr.msra.gmra.mxu0 %vm60_vm2, %v360_v50  ;;  %v350_v62 = vsel %vm222_vm7, %v1230_v13, %v342_v8  ;;  %v589_v59 = vsub.s32 2, %v1131_v10 }
  0xff   :  { %959 = vmatpush3.bf16.msra.mxu0 %v1204_v42  ;;  %v862_v63 = vadd.f32 -0.6931472, %v350_v62  ;;  %v366_v42 = vrot.slane %v1165_v21, %v365_v23 }
 0x100   :  { %v348_v4 = vsel %vm220_vm8, %v1234_v20, %v340_v61  ;;  %960 = vmatprep.subr.bf16.mxu0 %v592_v16  ;;  %v590_v1 = vrot.slane %v1165_v21, %v589_v59 }
 0x101   :  { %v860_v5 = vadd.f32 -0.6931472, %v348_v4  ;;  %v362_v11 = vpack.c.bf16 %v862_v63, %v861_v6 }
 0x103   :  { %v361_v7 = vpack.c.bf16 %v860_v5, %v859_v2  ;;  %961 = vmatpush3.bf16.msra.mxu0 %v592_v16 }
 0x105   :  { %944 = vmatprep.mubr.msk.bf16.mxu0 %vm60_vm2, %v361_v7 }
 0x106   :  { %945 = vmatmul.mubr.msk.bf16.gmra.mxu0 %vm60_vm2, %v362_v11 }
 0x198   :  { %v952_v0 = vpop.f32.mrf.mxu1 }
 0x19a   :  { %v544_v13 = vpop.f32.mrf.mxu1 }
 0x19c   :  { %v953_v38 = vpop.f32.mrf.mxu1 }
 0x19e   :  { %v547_v12 = vpop.f32.mrf.mxu1 }
 0x1a0   :  { %v956_v14 = vpop.f32.mrf.mxu1 }
 0x1a2   :  { %v560_v46 = vpop.f32.mrf.mxu1 }
 0x1a4   :  { %v957_v29 = vpop.f32.mrf.mxu1 }
 0x1a6   :  { %v563_v37 = vpop.f32.mrf.mxu1 }
 0x1be   :  { %v942_v55 = vpop.f32.mrf.mxu0 }
 0x1bf   :  { %v434_v58 = vadd.f32 %v942_v55, %v366_v42 }
 0x1c0   :  { %v425_v20 = vpop.f32.mrf.mxu0 }
 0x1c1   :  { %v426_v53 = vadd.f32 %v425_v20, %v366_v42  ;;  %v577_v28 = vmul.f32 %v952_v0, %v434_v58 }
 0x1c2   :  { %v943_v44 = vpop.f32.mrf.mxu0 }
 0x1c3   :  { %v437_v18 = vadd.f32 %v943_v44, %v366_v42  ;;  %v575_v26 = vmul.f32 %v544_v13, %v426_v53  ;;  %v111_v53 = vpop.permute.xlu1 %110 }
 0x1c4   :  { %v428_v19 = vpop.f32.mrf.mxu0  ;;  %v113_v32 = vadd.f32 %v111_v53, %v1218_v57 }
 0x1c5   :  { %v429_v22 = vadd.f32 %v428_v19, %v366_v42  ;;  %v578_v24 = vmul.f32 %v953_v38, %v437_v18  ;;  %v114_v18 = vadd.f32 %v111_v53, %v1226_v3 }
 0x1c6   :  { %v946_v25 = vpop.f32.mrf.mxu0 }
 0x1c7   :  { %v576_v27 = vmul.f32 %v547_v12, %v429_v22  ;;  %v584_v60 = vpack.c.bf16 %v578_v24, %v577_v28  ;;  %v450_v45 = vadd.f32 %v946_v25, %v366_v42 }
 0x1c8   :  { %v441_v48 = vpop.f32.mrf.mxu0 }
 0x1c9   :  { %v583_v52 = vpack.c.bf16 %v576_v27, %v575_v26  ;;  %v442_v23 = vadd.f32 %v441_v48, %v366_v42  ;;  %v581_v39 = vmul.f32 %v956_v14, %v450_v45 }
 0x1ca   :  { %v947_v30 = vpop.f32.mrf.mxu0 }
 0x1cb   :  { %v453_v31 = vadd.f32 %v947_v30, %v366_v42  ;;  %962 = vmatprep.mubr.msk.bf16.mxu0 %vm60_vm2, %v583_v52  ;;  %v579_v56 = vmul.f32 %v560_v46, %v442_v23 }
 0x1cc   :  { %v444_v47 = vpop.f32.mrf.mxu0  ;;  %963 = vmatmul.mubr.msk.bf16.vlgmr.msra.gmra.mxu0 %vm60_vm2, %v584_v60 }
 0x1cd   :  { %v445_v34 = vadd.f32 %v444_v47, %v366_v42  ;;  %v582_v36 = vmul.f32 %v957_v29, %v453_v31 }
 0x1cf   :  { %v580_v43 = vmul.f32 %v563_v37, %v445_v34  ;;  %v586_v49 = vpack.c.bf16 %v582_v36, %v581_v39 }
 0x1d1   :  { %v585_v40 = vpack.c.bf16 %v580_v43, %v579_v56 }
 0x1d3   :  { %966 = vmatprep.mubr.msk.bf16.mxu0 %vm60_vm2, %v585_v40 }
 0x1d4   :  { %967 = vmatmul.mubr.msk.bf16.gmra.mxu0 %vm60_vm2, %v586_v49 }
 0x28c   :  { %v964_v50 = vpop.f32.mrf.mxu0 }
 0x28d   :  { %v652_v0 = vadd.f32 %v964_v50, %v590_v1 }
 0x28e   :  { %v643_v51 = vpop.f32.mrf.mxu0 }
 0x28f   :  { %v644_v55 = vadd.f32 %v643_v51, %v590_v1 }
 0x290   :  { %v965_v54 = vpop.f32.mrf.mxu0 }
 0x291   :  { %v655_v7 = vadd.f32 %v965_v54, %v590_v1 }
 0x292   :  { %v646_v8 = vpop.f32.mrf.mxu0 }
 0x293   :  { %v675_v13 = vpack.c.bf16 %v655_v7, %v652_v0  ;;  %v647_v38 = vadd.f32 %v646_v8, %v590_v1 }
 0x294   :  { %v968_v41 = vpop.f32.mrf.mxu0 }
 0x295   :  { %v668_v16 = vadd.f32 %v968_v41, %v590_v1  ;;  %v674_v12 = vpack.c.bf16 %v647_v38, %v644_v55 }
 0x296   :  { %v659_v61 = vpop.f32.mrf.mxu0 }
 0x297   :  { %v660_v6 = vadd.f32 %v659_v61, %v590_v1 }
 0x298   :  { %v969_v62 = vpop.f32.mrf.mxu0 }
 0x299   :  { %v671_v63 = vadd.f32 %v969_v62, %v590_v1 }
 0x29a   :  { %v662_v4 = vpop.f32.mrf.mxu0 }
 0x29b   :  { %v677_v2 = vpack.c.bf16 %v671_v63, %v668_v16  ;;  %v663_v5 = vadd.f32 %v662_v4, %v590_v1  ;;  %v774_v1 = vsub.s32 4, %v1131_v10 }
 0x29d   :  { %971 = vmatpush3.bf16.msra.mxu1 %v677_v2  ;;  %v676_v11 = vpack.c.bf16 %v663_v5, %v660_v6  ;;  %v775_v62 = vrot.slane %v1165_v21, %v774_v1 }
 0x29e   :  { %972 = vmatprep.subr.bf16.mxu1 %v1066_v9 }
 0x2a1   :  { %973 = vmatpush3.bf16.msra.mxu1 %v676_v11 }
 0x2a2   :  { %974 = vmatprep.subr.bf16.mxu1 %v1066_v9 }
 0x2a5   :  { %975 = vmatpush3.bf16.msra.mxu1 %v675_v13 }
 0x2a6   :  { %976 = vmatprep.subr.bf16.mxu1 %v1066_v9 }
 0x2a9   :  { %977 = vmatpush3.bf16.msra.mxu1 %v674_v12 }
 0x2aa   :  { %982 = vmatprep.subr.bf16.mxu1 %v1066_v9 }
 0x2ac   :  { %979 = vmatmul.mubr.msk.bf16.vlgmr.msra.gmra.mxu1 %vm678_vm9, %v469_v35 }
 0x2ad   :  { %986 = vmatprep.mubr.msk.bf16.mxu1 %vm1067_vm1, %v1066_v9 }
 0x36c   :  { %v716_v42 = vpop.f32.mrf.mxu1 }
 0x36d   :  { %725 = vrot.lane.b32.xlu1 %v716_v42, %s1069_s0 }
 0x36e   :  { %v980_v20 = vpop.f32.mrf.mxu1 }
 0x370   :  { %v719_v44 = vpop.f32.mrf.mxu1 }
 0x371   :  { %727 = vrot.lane.b32.xlu1 %v719_v44, %s1069_s0 }
 0x372   :  { %v981_v14 = vpop.f32.mrf.mxu1 }
 0x375   :  { %781 = vrot.lane.b32.xlu1 %v1145_v15, %s1069_s0 }
 0x379   :  { %779 = vrot.lane.b32.xlu1 %v1151_v17, %s1069_s0 }
 0x3df   :  { %v726_v33 = vpop.permute.xlu1 %725 }
 0x3e0   :  { %v731_v35 = vadd.f32 %v726_v33, %v113_v32 }
 0x3e2   :  { %v739_v58 = vand.u32 2147483647, %v731_v35  ;;  %v733_v34 = vmax.f32 %v731_v35, 0.0  ;;  %vm735_vm11 = vcmp.ne.f32.partialorder %v731_v35, %v731_v35 }
 0x3e3   :  { %v728_v19 = vpop.permute.xlu1 %727 }
 0x3e4   :  { %v741_v22 = vsub.f32 0.0, %v739_v58  ;;  %v732_v24 = vadd.f32 %v728_v19, %v114_v18 }
 0x3e6   :  { %v743_v46 = vmul.f32 1.442695, %v741_v22  ;;  %v740_v25 = vand.u32 2147483647, %v732_v24  ;;  %v734_v40 = vmax.f32 %v732_v24, 0.0  ;;  %vm736_vm12 = vcmp.ne.f32.partialorder %v732_v24, %v732_v24 }
 0x3e7   :  { %v782_v26 = vpop.permute.xlu1 %781 }
 0x3e8   :  { %1036 = vpow2.f32 %v743_v46  ;;  %v742_v27 = vsub.f32 0.0, %v740_v25  ;;  %983 = vmatpush3.bf16.msra.mxu1 %v782_v26 }
 0x3e9   :  { %984 = vmatprep.subr.bf16.mxu1 %v1066_v9 }
 0x3ea   :  { %v745_v15 = vmul.f32 1.442695, %v742_v27 }
 0x3eb   :  { %v780_v17 = vpop.permute.xlu1 %779 }
 0x3ec   :  { %1038 = vpow2.f32 %v745_v15  ;;  %985 = vmatpush3.bf16.msra.mxu1 %v780_v17 }
 0x3f5   :  { %v1037_v57 = vpop.eup %1036 }
 0x3f6   :  { %v747_v28 = vadd.f32 1.0, %v1037_v57  ;;  %v750_v52 = vmul.f32 -0.5, %v1037_v57  ;;  %v753_v30 = vand.u32 2147483647, %v1037_v57 }
 0x3f8   :  { %1040 = vlog2.f32 %v747_v28  ;;  %v751_v60 = vadd.f32 1.0, %v750_v52  ;;  %vm754_vm1 = vcmp.lt.f32.partialorder %v753_v30, 0.0004427343 }
 0x3f9   :  { %v1039_v3 = vpop.eup %1038 }
 0x3fa   :  { %v756_v48 = vadd.f32 1.0, %v1039_v3  ;;  %v759_v29 = vmul.f32 -0.5, %v1039_v3  ;;  %v752_v45 = vmul.f32 %v1037_v57, %v751_v60  ;;  %v762_v9 = vand.u32 2147483647, %v1039_v3 }
 0x3fc   :  { %1042 = vlog2.f32 %v756_v48  ;;  %v760_v47 = vadd.f32 1.0, %v759_v29  ;;  %vm763_vm10 = vcmp.lt.f32.partialorder %v762_v9, 0.0004427343 }
 0x3fe   :  { %v761_v39 = vmul.f32 %v1039_v3, %v760_v47 }
 0x405   :  { %v1041_v23 = vpop.eup %1040 }
 0x406   :  { %v749_v31 = vmul.f32 0.6931472, %v1041_v23 }
 0x408   :  { %v755_v37 = vsel %vm754_vm1, %v752_v45, %v749_v31 }
 0x409   :  { %v1043_v36 = vpop.eup %1042  ;;  %v765_v56 = vadd.f32 %v755_v37, %v733_v34 }
 0x40a   :  { %v758_v43 = vmul.f32 0.6931472, %v1043_v36 }
 0x40b   :  { %v767_v51 = vsel %vm735_vm11, %v731_v35, %v765_v56 }
 0x40c   :  { %v764_v49 = vsel %vm763_vm10, %v761_v39, %v758_v43  ;;  %v882_v8 = vadd.f32 -0.6931472, %v767_v51 }
 0x40d   :  { %v766_v50 = vadd.f32 %v764_v49, %v734_v40 }
 0x40f   :  { %v768_v54 = vsel %vm736_vm12, %v732_v24, %v766_v50 }
 0x410   :  { %v883_v59 = vadd.f32 -0.6931472, %v768_v54 }
 0x412   :  { %v771_v41 = vpack.c.bf16 %v883_v59, %v882_v8 }
 0x414   :  { %777 = vrot.lane.b32.xlu1 %v771_v41, %s1070_s4 }
 0x486   :  { %v778_v61 = vpop.permute.xlu1 %777 }
 0x487   :  { %987 = vmatmul.mubr.msk.bf16.vlgmr.msra.gmra.mxu1 %vm60_vm2, %v778_v61 }
 0x547   :  { %v822_v16 = vpop.f32.mrf.mxu1 }
 0x548   :  { %v823_v63 = vadd.f32 %v822_v16, %v775_v62 }
 0x549   :  { %v988_v4 = vpop.f32.mrf.mxu1 }
 0x54a   :  { %829 = vst.msk [vmem:[#allocation2] sm:$0xff] %vm60_vm2, %v823_v63 }
 0x54b   :  { %v825_v2 = vpop.f32.mrf.mxu1 }
 0x54c   :  { %v826_v5 = vadd.f32 %v825_v2, %v775_v62 }
 0x54d   :  { %v989_v6 = vpop.f32.mrf.mxu1 }
 0x54e   :  { %830 = vst.msk [vmem:[#allocation2 + $0x8] sm:$0xff] %vm60_vm2, %v826_v5 }
 0x54f   :  { %1055 = shalt.err (!%p1052_p4)
}
 0x550   :  { %s1072_s7 = smov 128   ;;  %s1073_s8 = smov 8  }
 0x551   :  { %842 = dma.vmem_to_hbm [thread:$0]  %s837_s29, 256, %s1397_s6, [#allocation3], %s1072_s7, %s1072_s7, %s1073_s8  }
 0x552   :  { %1064 = dma.done.wait [#allocation3], 256  }
 0x553   :  { %1065 = vsyncadd [#allocation3], 4294967040 }
 0x554   :  { %846 = vsyncpa [#allocation3], 1 }

</bundles_post_ra>
